<compile_context>
chip_gen: v7x
topology: tpu7x:2x2x1
jax: 0.10.0
libtpu: 0.0.40
codegen_flags: <defaults>
</compile_context>

<pallas_src>
import functools

import jax
import jax.numpy as jnp
from jax import lax
from jax.experimental import pallas as pl
from jax.experimental.pallas import tpu as pltpu

LANE = 128
SUB = 8
BLOCK = SUB * LANE              # 1024 elements: granularity handled by the kernel
_MAX_TILE_ROWS = 8192           # (8192, 128) f32 tile = 4 MiB per input per buffer
_CHUNK_ROWS_PREF = (32, 16, 8)  # single-pass register-chunk row sizes (preference order)


def _tile_partial_sums(p_ref, t_ref, *, tile_rows, chunk_rows, masked,
                       row_offset, rows):
    """Reduce one (tile_rows, LANE) tile to six (SUB, LANE) f32 partial sums.

    Single pass: each (chunk_rows, LANE) slab of p / t is loaded from VMEM
    once, upcast to f32, and all six sums are accumulated from registers
    (fori_loop carries).  `masked` is Python-static: when True, rows whose
    global row id >= rows are zeroed before any arithmetic, so garbage in the
    out-of-extent part of a partial edge block never leaks into the sums.
    """
    groups = chunk_rows // SUB
    num_chunks = tile_rows // chunk_rows

    def fold(x):
        # (chunk_rows, LANE) -> (SUB, LANE): reduce over the leading (untiled)
        # dim == pure per-vreg VPU adds, no cross-lane traffic.
        if groups == 1:
            return x
        return jnp.sum(x.reshape(groups, SUB, LANE), axis=0)

    def body(c, carry):
        sx, sy, sxy, sx2, sy2, ssq = carry
        r0 = c * chunk_rows
        p = p_ref[pl.ds(r0, chunk_rows), :].astype(jnp.float32)
        t = t_ref[pl.ds(r0, chunk_rows), :].astype(jnp.float32)
        if masked:
            rid = row_offset + r0 + lax.broadcasted_iota(
                jnp.int32, (chunk_rows, LANE), 0)
            keep = rid < rows
            p = jnp.where(keep, p, 0.0)
            t = jnp.where(keep, t, 0.0)
        d = p - t
        return (sx + fold(p),
                sy + fold(t),
                sxy + fold(p * t),
                sx2 + fold(p * p),
                sy2 + fold(t * t),
                ssq + fold(d * d))   # direct squared error (no cancellation)

    init = (jnp.zeros((SUB, LANE), jnp.float32),) * 6
    if num_chunks == 1:
        return body(0, init)
    return lax.fori_loop(0, num_chunks, body, init, unroll=8)


def _partial_sums_kernel(p_ref, t_ref, acc_ref, *, rows, tile_rows, chunk_rows,
                         tiles_per_core, num_tiles, has_ragged):
    """Accumulate partial sums; acc block (6, SUB, LANE) stays resident over k.

    acc rows: 0..5 = sum_x, sum_y, sum_xy, sum_x2, sum_y2, sum_sq_diff.
    """
    i = pl.program_id(0)           # core-split axis ("parallel")
    k = pl.program_id(1)           # reduction axis ("arbitrary")
    g = i * tiles_per_core + k     # global tile index

    @pl.when(k == 0)
    def _init():
        acc_ref[...] = jnp.zeros_like(acc_ref)

    def accumulate(masked):
        sums = _tile_partial_sums(
            p_ref, t_ref, tile_rows=tile_rows, chunk_rows=chunk_rows,
            masked=masked, row_offset=g * tile_rows, rows=rows)
        for idx in range(6):
            acc_ref[idx] += sums[idx]

    if not has_ragged:
        accumulate(masked=False)
    elif num_tiles == 1:
        accumulate(masked=True)
    else:
        # Only the globally-last tile straddles the row boundary: scalar
        # branch so interior tiles pay zero masking cost.
        is_edge = g == num_tiles - 1

        @pl.when(jnp.logical_not(is_edge))
        def _interior():
            accumulate(masked=False)

        @pl.when(is_edge)
        def _edge():
            accumulate(masked=True)


def _partial_sums(p2d, t2d, rows, tile_rows, chunk_rows, num_cores):
    num_tiles = pl.cdiv(rows, tile_rows)
    assert num_tiles % num_cores == 0          # core split is always even
    tiles_per_core = num_tiles // num_cores
    has_ragged = (rows % tile_rows) != 0

    def in_index(i, k):
        return (i * tiles_per_core + k, 0)

    kernel = functools.partial(
        _partial_sums_kernel, rows=rows, tile_rows=tile_rows,
        chunk_rows=chunk_rows, tiles_per_core=tiles_per_core,
        num_tiles=num_tiles, has_ragged=has_ragged)

    return pl.pallas_call(
        kernel,
        out_shape=jax.ShapeDtypeStruct((num_cores * 6, SUB, LANE), jnp.float32),
        grid_spec=pltpu.PrefetchScalarGridSpec(
            num_scalar_prefetch=0,
            grid=(num_cores, tiles_per_core),
            in_specs=[pl.BlockSpec((tile_rows, LANE), in_index),
                      pl.BlockSpec((tile_rows, LANE), in_index)],
            # Constant block index along k -> accumulator stays resident in
            # VMEM across the reduction, one HBM writeback per core slice.
            out_specs=pl.BlockSpec((6, SUB, LANE), lambda i, k: (i, 0, 0)),
        ),
        compiler_params=pltpu.CompilerParams(
            dimension_semantics=("parallel", "arbitrary"),
            vmem_limit_bytes=32 * 1024 * 1024,
        ),
    )(p2d, t2d)


def combined_loss(predictions, targets, *, max_tile_rows=_MAX_TILE_ROWS):
    """MSELoss(mean) + (1 - Pearson) over the flattened tensors (f32 accumulation)."""
    p = predictions.reshape(-1)   # free view; dtype upcast happens in-kernel
    t = targets.reshape(-1)
    n = p.shape[0]

    main = (n // BLOCK) * BLOCK   # prefix handled by the Pallas kernel
    rows = main // LANE           # always a multiple of SUB

    # Ragged tail (< 1024 elements): reduced in plain JAX instead of padding
    # (and re-copying) both inputs in HBM.
    if main != n:
        pt = p[main:].astype(jnp.float32)
        tt = t[main:].astype(jnp.float32)
        dt = pt - tt
        tail = jnp.stack([jnp.sum(pt), jnp.sum(tt), jnp.sum(pt * tt),
                          jnp.sum(pt * pt), jnp.sum(tt * tt), jnp.sum(dt * dt)])
    else:
        tail = jnp.zeros((6,), jnp.float32)

    if rows > 0:
        # TODO(synk): when n is not a multiple of 1024 the prefix slice below
        # still materializes a copy; fully copy-free ragged handling would
        # need manual DMA from 1-D HBM refs.
        p2d = (p if main == n else p[:main]).reshape(rows, LANE)
        t2d = (t if main == n else t[:main]).reshape(rows, LANE)

        max_tile_rows = max(SUB, (int(max_tile_rows) // SUB) * SUB)
        tile_rows = min(max_tile_rows, rows)
        chunk_rows = next(c for c in _CHUNK_ROWS_PREF if tile_rows % c == 0)
        num_tiles = pl.cdiv(rows, tile_rows)
        # Use both TensorCores (v7x megacore) only when the split is even, so
        # single-core chips never pay for duplicated / masked filler tiles.
        num_cores = 2 if (num_tiles >= 2 and num_tiles % 2 == 0) else 1

        acc = _partial_sums(p2d, t2d, rows, tile_rows, chunk_rows, num_cores)
        sums = jnp.sum(acc.reshape(num_cores, 6, SUB * LANE), axis=(0, 2)) + tail
    else:
        sums = tail

    sum_x, sum_y, sum_xy, sum_x2, sum_y2, sum_sq = (sums[j] for j in range(6))
    tN = jnp.float32(n)
    pearson = (tN * sum_xy - sum_x * sum_y) / jnp.sqrt(
        (tN * sum_x2 - sum_x * sum_x) * (tN * sum_y2 - sum_y * sum_y))
    mse = sum_sq / tN
    return mse + (1.0 - pearson)


def _reference_loss(predictions, targets):
    p = predictions.reshape(-1).astype(jnp.float32)
    t = targets.reshape(-1).astype(jnp.float32)
    n = jnp.float32(p.shape[0])
    mse = jnp.mean((p - t) ** 2)
    pearson = (n * jnp.sum(p * t) - jnp.sum(p) * jnp.sum(t)) / jnp.sqrt(
        (n * jnp.sum(p * p) - jnp.sum(p) ** 2)
        * (n * jnp.sum(t * t) - jnp.sum(t) ** 2))
    return mse + (1.0 - pearson)


if __name__ == "__main__":
    def _check(pred, targ, **kw):
        out = jax.block_until_ready(combined_loss(pred, targ, **kw))
        ref = jax.block_until_ready(_reference_loss(pred, targ))
        assert jnp.allclose(out, ref, rtol=1e-4, atol=1e-5), (out, ref, kw)

    # Main example: NCHW-like inputs consistent with the loss module.
    kp, kt = jax.random.split(jax.random.PRNGKey(0))
    predictions = jax.random.normal(kp, (2, 4, 16, 16), dtype=jnp.float32)
    targets = 0.5 * predictions + 0.1 * jax.random.normal(
        kt, (2, 4, 16, 16), dtype=jnp.float32)
    _check(predictions, targets)

    # Ragged total size: the < 1024-element tail is handled in plain JAX.
    kp2, kt2 = jax.random.split(jax.random.PRNGKey(1))
    p2 = jax.random.normal(kp2, (3, 5, 7, 11), dtype=jnp.float32)
    t2 = 0.25 * p2 + 0.2 * jax.random.normal(kt2, p2.shape, dtype=jnp.float32)
    _check(p2, t2)

    # Forced small tiles: multi-tile reduction + masked edge tile (odd tile
    # count -> single-core grid, ragged last tile).
    kp3, kt3 = jax.random.split(jax.random.PRNGKey(2))
    p3 = jax.random.normal(kp3, (2, 4, 16, 40), dtype=jnp.float32)   # 5120 elems -> 40 rows
    t3 = 0.75 * p3 + 0.3 * jax.random.normal(kt3, p3.shape, dtype=jnp.float32)
    _check(p3, t3, max_tile_rows=16)                                 # 3 tiles, ragged edge

    # Forced small tiles: even tile count -> 2-way "parallel" core split.
    kp4, kt4 = jax.random.split(jax.random.PRNGKey(3))
    p4 = jax.random.normal(kp4, (2, 4, 32, 32), dtype=jnp.float32)   # 8192 elems -> 64 rows
    t4 = -0.5 * p4 + 0.2 * jax.random.normal(kt4, p4.shape, dtype=jnp.float32)
    _check(p4, t4, max_tile_rows=16)                                 # 4 tiles, 2 "cores"

    print("KERNEL_OK")
</pallas_src>

<mosaic_0001>
module attributes {stable_mosaic.version = 11 : i64} {
  func.func @_partial_sums_kernel(%arg0: i32, %arg1: i32, %arg2: memref<16x128xf32, #tpu.memory_space<vmem>>, %arg3: memref<16x128xf32, #tpu.memory_space<vmem>>, %arg4: memref<6x8x128xf32, #tpu.memory_space<vmem>>) attributes {dimension_semantics = [#tpu.dimension_semantics<parallel>, #tpu.dimension_semantics<arbitrary>], iteration_bounds = array<i64: 1, 1>, scalar_prefetch = 0 : i64, scratch_operands = 0 : i64, tpu.core_type = #tpu.core_type<tc>, window_params = [{transform_indices = @transform_0, window_bounds = array<i64: 16, 128>}, {transform_indices = @transform_1, window_bounds = array<i64: 16, 128>}, {transform_indices = @transform_2, window_bounds = array<i64: 6, 8, 128>}]} {
    %c0_i32 = arith.constant 0 : i32
    %0 = arith.cmpi eq, %arg1, %c0_i32 : i32
    %1 = arith.extui %0 : i1 to i32
    %c0_i32_0 = arith.constant 0 : i32
    %2 = arith.cmpi ne, %1, %c0_i32_0 : i32
    scf.if %2 {
      %cst_41 = arith.constant 0.000000e+00 : f32
      %65 = vector.broadcast %cst_41 : f32 to vector<6x8x128xf32>
      %c0_42 = arith.constant 0 : index
      %c0_43 = arith.constant 0 : index
      %c0_44 = arith.constant 0 : index
      %66 = vector.load %arg4[%c0_42, %c0_43, %c0_44] : memref<6x8x128xf32, #tpu.memory_space<vmem>>, vector<6x8x128xf32>
      tpu.vector_store %arg4[%c0_42, %c0_43, %c0_44], %65 {strides = array<i32>} : memref<6x8x128xf32, #tpu.memory_space<vmem>>, vector<6x8x128xf32>,
    } else {
    }
    %cst = arith.constant 0.000000e+00 : f32
    %3 = vector.broadcast %cst : f32 to vector<8x128xf32>
    %c0 = arith.constant 0 : index
    %c0_1 = arith.constant 0 : index
    %4 = vector.load %arg2[%c0, %c0_1] : memref<16x128xf32, #tpu.memory_space<vmem>>, vector<16x128xf32>
    %c0_2 = arith.constant 0 : index
    %c0_3 = arith.constant 0 : index
    %5 = vector.load %arg3[%c0_2, %c0_3] : memref<16x128xf32, #tpu.memory_space<vmem>>, vector<16x128xf32>
    %6 = arith.subf %4, %5 : vector<16x128xf32>
    %7 = vector.shape_cast %4 : vector<16x128xf32> to vector<2x8x128xf32>
    %cst_4 = arith.constant dense<0.000000e+00> : vector<8x128xf32>
    %8 = vector.multi_reduction <add>, %7, %cst_4 [0] : vector<2x8x128xf32> to vector<8x128xf32>
    %9 = arith.addf %3, %8 : vector<8x128xf32>
    %10 = vector.shape_cast %5 : vector<16x128xf32> to vector<2x8x128xf32>
    %cst_5 = arith.constant dense<0.000000e+00> : vector<8x128xf32>
    %11 = vector.multi_reduction <add>, %10, %cst_5 [0] : vector<2x8x128xf32> to vector<8x128xf32>
    %12 = arith.addf %3, %11 : vector<8x128xf32>
    %13 = arith.mulf %4, %5 : vector<16x128xf32>
    %14 = vector.shape_cast %13 : vector<16x128xf32> to vector<2x8x128xf32>
    %cst_6 = arith.constant dense<0.000000e+00> : vector<8x128xf32>
    %15 = vector.multi_reduction <add>, %14, %cst_6 [0] : vector<2x8x128xf32> to vector<8x128xf32>
    %16 = arith.addf %3, %15 : vector<8x128xf32>
    %17 = arith.mulf %4, %4 : vector<16x128xf32>
    %18 = vector.shape_cast %17 : vector<16x128xf32> to vector<2x8x128xf32>
    %cst_7 = arith.constant dense<0.000000e+00> : vector<8x128xf32>
    %19 = vector.multi_reduction <add>, %18, %cst_7 [0] : vector<2x8x128xf32> to vector<8x128xf32>
    %20 = arith.addf %3, %19 : vector<8x128xf32>
    %21 = arith.mulf %5, %5 : vector<16x128xf32>
    %22 = vector.shape_cast %21 : vector<16x128xf32> to vector<2x8x128xf32>
    %cst_8 = arith.constant dense<0.000000e+00> : vector<8x128xf32>
    %23 = vector.multi_reduction <add>, %22, %cst_8 [0] : vector<2x8x128xf32> to vector<8x128xf32>
    %24 = arith.addf %3, %23 : vector<8x128xf32>
    %25 = arith.mulf %6, %6 : vector<16x128xf32>
    %26 = vector.shape_cast %25 : vector<16x128xf32> to vector<2x8x128xf32>
    %cst_9 = arith.constant dense<0.000000e+00> : vector<8x128xf32>
    %27 = vector.multi_reduction <add>, %26, %cst_9 [0] : vector<2x8x128xf32> to vector<8x128xf32>
    %28 = arith.addf %3, %27 : vector<8x128xf32>
    %c0_10 = arith.constant 0 : index
    %c0_11 = arith.constant 0 : index
    %c0_12 = arith.constant 0 : index
    %29 = vector.load %arg4[%c0_10, %c0_11, %c0_12] : memref<6x8x128xf32, #tpu.memory_space<vmem>>, vector<1x8x128xf32>
    %30 = vector.shape_cast %29 : vector<1x8x128xf32> to vector<8x128xf32>
    %31 = arith.addf %30, %9 : vector<8x128xf32>
    %c0_13 = arith.constant 0 : index
    %c0_14 = arith.constant 0 : index
    %c0_15 = arith.constant 0 : index
    %32 = vector.load %arg4[%c0_13, %c0_14, %c0_15] : memref<6x8x128xf32, #tpu.memory_space<vmem>>, vector<1x8x128xf32>
    %33 = vector.shape_cast %32 : vector<1x8x128xf32> to vector<8x128xf32>
    %34 = vector.shape_cast %31 : vector<8x128xf32> to vector<1x8x128xf32>
    tpu.vector_store %arg4[%c0_13, %c0_14, %c0_15], %34 {strides = array<i32>} : memref<6x8x128xf32, #tpu.memory_space<vmem>>, vector<1x8x128xf32>,
    %c1 = arith.constant 1 : index
    %c0_16 = arith.constant 0 : index
    %c0_17 = arith.constant 0 : index
    %35 = vector.load %arg4[%c1, %c0_16, %c0_17] : memref<6x8x128xf32, #tpu.memory_space<vmem>>, vector<1x8x128xf32>
    %36 = vector.shape_cast %35 : vector<1x8x128xf32> to vector<8x128xf32>
    %37 = arith.addf %36, %12 : vector<8x128xf32>
    %c1_18 = arith.constant 1 : index
    %c0_19 = arith.constant 0 : index
    %c0_20 = arith.constant 0 : index
    %38 = vector.load %arg4[%c1_18, %c0_19, %c0_20] : memref<6x8x128xf32, #tpu.memory_space<vmem>>, vector<1x8x128xf32>
    %39 = vector.shape_cast %38 : vector<1x8x128xf32> to vector<8x128xf32>
    %40 = vector.shape_cast %37 : vector<8x128xf32> to vector<1x8x128xf32>
    tpu.vector_store %arg4[%c1_18, %c0_19, %c0_20], %40 {strides = array<i32>} : memref<6x8x128xf32, #tpu.memory_space<vmem>>, vector<1x8x128xf32>,
    %c2 = arith.constant 2 : index
    %c0_21 = arith.constant 0 : index
    %c0_22 = arith.constant 0 : index
    %41 = vector.load %arg4[%c2, %c0_21, %c0_22] : memref<6x8x128xf32, #tpu.memory_space<vmem>>, vector<1x8x128xf32>
    %42 = vector.shape_cast %41 : vector<1x8x128xf32> to vector<8x128xf32>
    %43 = arith.addf %42, %16 : vector<8x128xf32>
    %c2_23 = arith.constant 2 : index
    %c0_24 = arith.constant 0 : index
    %c0_25 = arith.constant 0 : index
    %44 = vector.load %arg4[%c2_23, %c0_24, %c0_25] : memref<6x8x128xf32, #tpu.memory_space<vmem>>, vector<1x8x128xf32>
    %45 = vector.shape_cast %44 : vector<1x8x128xf32> to vector<8x128xf32>
    %46 = vector.shape_cast %43 : vector<8x128xf32> to vector<1x8x128xf32>
    tpu.vector_store %arg4[%c2_23, %c0_24, %c0_25], %46 {strides = array<i32>} : memref<6x8x128xf32, #tpu.memory_space<vmem>>, vector<1x8x128xf32>,
    %c3 = arith.constant 3 : index
    %c0_26 = arith.constant 0 : index
    %c0_27 = arith.constant 0 : index
    %47 = vector.load %arg4[%c3, %c0_26, %c0_27] : memref<6x8x128xf32, #tpu.memory_space<vmem>>, vector<1x8x128xf32>
    %48 = vector.shape_cast %47 : vector<1x8x128xf32> to vector<8x128xf32>
    %49 = arith.addf %48, %20 : vector<8x128xf32>
    %c3_28 = arith.constant 3 : index
    %c0_29 = arith.constant 0 : index
    %c0_30 = arith.constant 0 : index
    %50 = vector.load %arg4[%c3_28, %c0_29, %c0_30] : memref<6x8x128xf32, #tpu.memory_space<vmem>>, vector<1x8x128xf32>
    %51 = vector.shape_cast %50 : vector<1x8x128xf32> to vector<8x128xf32>
    %52 = vector.shape_cast %49 : vector<8x128xf32> to vector<1x8x128xf32>
    tpu.vector_store %arg4[%c3_28, %c0_29, %c0_30], %52 {strides = array<i32>} : memref<6x8x128xf32, #tpu.memory_space<vmem>>, vector<1x8x128xf32>,
    %c4 = arith.constant 4 : index
    %c0_31 = arith.constant 0 : index
    %c0_32 = arith.constant 0 : index
    %53 = vector.load %arg4[%c4, %c0_31, %c0_32] : memref<6x8x128xf32, #tpu.memory_space<vmem>>, vector<1x8x128xf32>
    %54 = vector.shape_cast %53 : vector<1x8x128xf32> to vector<8x128xf32>
    %55 = arith.addf %54, %24 : vector<8x128xf32>
    %c4_33 = arith.constant 4 : index
    %c0_34 = arith.constant 0 : index
    %c0_35 = arith.constant 0 : index
    %56 = vector.load %arg4[%c4_33, %c0_34, %c0_35] : memref<6x8x128xf32, #tpu.memory_space<vmem>>, vector<1x8x128xf32>
    %57 = vector.shape_cast %56 : vector<1x8x128xf32> to vector<8x128xf32>
    %58 = vector.shape_cast %55 : vector<8x128xf32> to vector<1x8x128xf32>
    tpu.vector_store %arg4[%c4_33, %c0_34, %c0_35], %58 {strides = array<i32>} : memref<6x8x128xf32, #tpu.memory_space<vmem>>, vector<1x8x128xf32>,
    %c5 = arith.constant 5 : index
    %c0_36 = arith.constant 0 : index
    %c0_37 = arith.constant 0 : index
    %59 = vector.load %arg4[%c5, %c0_36, %c0_37] : memref<6x8x128xf32, #tpu.memory_space<vmem>>, vector<1x8x128xf32>
    %60 = vector.shape_cast %59 : vector<1x8x128xf32> to vector<8x128xf32>
    %61 = arith.addf %60, %28 : vector<8x128xf32>
    %c5_38 = arith.constant 5 : index
    %c0_39 = arith.constant 0 : index
    %c0_40 = arith.constant 0 : index
    %62 = vector.load %arg4[%c5_38, %c0_39, %c0_40] : memref<6x8x128xf32, #tpu.memory_space<vmem>>, vector<1x8x128xf32>
    %63 = vector.shape_cast %62 : vector<1x8x128xf32> to vector<8x128xf32>
    %64 = vector.shape_cast %61 : vector<8x128xf32> to vector<1x8x128xf32>
    tpu.vector_store %arg4[%c5_38, %c0_39, %c0_40], %64 {strides = array<i32>} : memref<6x8x128xf32, #tpu.memory_space<vmem>>, vector<1x8x128xf32>,
    return
  }
  func.func @transform_0(%arg0: i32, %arg1: i32) -> (i32, i32) {
    %c1_i32 = arith.constant 1 : i32
    %0 = arith.muli %arg0, %c1_i32 : i32
    %1 = arith.addi %0, %arg1 : i32
    %c0_i32 = arith.constant 0 : i32
    %c0_i32_0 = arith.constant 0 : i32
    return %1, %c0_i32 : i32, i32
  }
  func.func @transform_1(%arg0: i32, %arg1: i32) -> (i32, i32) {
    %c1_i32 = arith.constant 1 : i32
    %0 = arith.muli %arg0, %c1_i32 : i32
    %1 = arith.addi %0, %arg1 : i32
    %c0_i32 = arith.constant 0 : i32
    %c0_i32_0 = arith.constant 0 : i32
    return %1, %c0_i32 : i32, i32
  }
  func.func @transform_2(%arg0: i32, %arg1: i32) -> (i32, i32, i32) {
    %c0_i32 = arith.constant 0 : i32
    %c0_i32_0 = arith.constant 0 : i32
    %c0_i32_1 = arith.constant 0 : i32
    return %arg0, %c0_i32, %c0_i32_0 : i32, i32, i32
  }
}

</mosaic_0001>

<bundles_post_ra>
// kernel: tpu_custom_call.1
= control target key start
LH: loop header
LB: loop body
LE: loop exit
PB: predicated region body
PF: predicated region fallthrough
CT: control target
= control target key end

     0   :  { %7 = vsyncpa [#allocation3], 0  ;;  %s272_s0 = inlined_call_operand.hbm [shape: f32[16,128], index: 0, kind: input, shape index: {}]   ;;  %s273_s1 = inlined_call_operand.hbm [shape: f32[16,128], index: 1, kind: input, shape index: {}]   ;;  %s274_s2 = inlined_call_operand.hbm [shape: f32[6,8,128], index: 2, kind: output, shape index: {}]  }
   0x1   :  { %8 = vsyncpa [#allocation6], 0 }
   0x2   :  { %9 = vsyncpa [#allocation4], 0  ;;  %s207_s9 = smov [#allocation2]   ;;  %s135_s13 = scalar_lea.hbm %s272_s0, 256 }
   0x3   :  { %s19_s10 = sshll.u32 %s207_s9, 4  ;;  %p136_p0 = scmp.ne.s32.totalorder %s272_s0, %s135_s13  ;;  %s20_s10 = int_to_ptr.vmem [resolvable:$true] %s19_s10 }
   0x4   :  { %p139_p1 = scmp.lt.u32.totalorder %s135_s13, %s272_s0 }
   0x6   :  { %p141_p2 = pnand %p139_p1, %p136_p0 }
   0x8   :  { %144 = shalt.err (!%p141_p2)
}
   0x9   :  { %s145_s18 = scalar_lea.vmem %s20_s10, 256  ;;  %p150_p4 = scmp.lt.s32.totalorder %s20_s10, %s20_s10 }
   0xa   :  { %p146_p3 = scmp.ne.s32.totalorder %s20_s10, %s145_s18  ;;  %p151_p5 = scmp.lt.s32.totalorder %s145_s18, %s145_s18 }
   0xc   :  { %p152_p6 = por %p151_p5, %p150_p4 }
   0xe   :  { %p153_p7 = pnand %p152_p6, %p146_p3 }
  0x10   :  { %156 = shalt.err (!%p153_p7)
}
  0x11   :  { %s208_s19 = smov 128   ;;  %s209_s20 = smov 8  }
  0x12   :  { %25 = dma.hbm_to_vmem [thread:$0]  %s272_s0, 256, %s20_s10, [#allocation3], %s208_s19, %s208_s19, %s209_s20  }
  0x13   :  { %s210_s23 = smov [#allocation5]   ;;  %s157_s27 = scalar_lea.hbm %s273_s1, 256 }
  0x14   :  { %s35_s24 = sshll.u32 %s210_s23, 4  ;;  %p158_p8 = scmp.ne.s32.totalorder %s273_s1, %s157_s27  ;;  %s36_s24 = int_to_ptr.vmem [resolvable:$true] %s35_s24 }
  0x15   :  { %p161_p9 = scmp.lt.u32.totalorder %s157_s27, %s273_s1 }
  0x17   :  { %p163_p10 = pnand %p161_p9, %p158_p8 }
  0x19   :  { %166 = shalt.err (!%p163_p10)
}
  0x1a   :  { %s167_s4 = scalar_lea.vmem %s36_s24, 256  ;;  %p172_p12 = scmp.lt.s32.totalorder %s36_s24, %s36_s24 }
  0x1b   :  { %p168_p11 = scmp.ne.s32.totalorder %s36_s24, %s167_s4  ;;  %p173_p13 = scmp.lt.s32.totalorder %s167_s4, %s167_s4 }
  0x1d   :  { %p174_p0 = por %p173_p13, %p172_p12 }
  0x1f   :  { %p175_p1 = pnand %p174_p0, %p168_p11 }
  0x21   :  { %178 = shalt.err (!%p175_p1)
}
  0x22   :  { %41 = dma.hbm_to_vmem [thread:$0]  %s273_s1, 256, %s36_s24, [#allocation6], %s208_s19, %s208_s19, %s209_s20  }
  0x23   :  { %201 = dma.done.wait [#allocation3], 256  }
  0x24   :  { %202 = vsyncadd [#allocation3], 4294967040 }
  0x25   :  { %203 = dma.done.wait [#allocation6], 256  }
  0x26   :  { %204 = vsyncadd [#allocation6], 4294967040  ;;  %v62_v0 = vld [vmem:[#allocation2] sm:$0xff]  ;;  %v63_v1 = vld [vmem:[#allocation2 + $0x8] sm:$0xff]  ;;  %s211_s1 = smov [#allocation7]  }
  0x27   :  { %v64_v2 = vld [vmem:[#allocation5] sm:$0xff]  ;;  %v68_v3 = vadd.f32 %v63_v1, %v62_v0  ;;  %v65_v4 = vld [vmem:[#allocation5 + $0x8] sm:$0xff]  ;;  %v76_v6 = vmul.f32 %v62_v0, %v62_v0  ;;  %v77_v7 = vmul.f32 %v63_v1, %v63_v1  ;;  %s116_s6 = sshll.u32 %s211_s1, 4  ;;  %s117_s6 = int_to_ptr.vmem [resolvable:$true] %s116_s6 }
  0x28   :  { %v72_v5 = vmul.f32 %v64_v2, %v62_v0  ;;  %v70_v8 = vadd.f32 %v65_v4, %v64_v2  ;;  %v73_v9 = vmul.f32 %v65_v4, %v63_v1  ;;  %v80_v10 = vmul.f32 %v64_v2, %v64_v2  ;;  %s179_s7 = scalar_lea.vmem %s117_s6, 768  ;;  %p184_p3 = scmp.lt.s32.totalorder %s117_s6, %s117_s6 }
  0x29   :  { %v81_v11 = vmul.f32 %v65_v4, %v65_v4  ;;  %v78_v12 = vadd.f32 %v77_v7, %v76_v6  ;;  %v66_v13 = vsub.f32 %v62_v0, %v64_v2  ;;  %v67_v14 = vsub.f32 %v63_v1, %v65_v4  ;;  %90 = vst [vmem:[#allocation7] sm:$0xff] %v68_v3  ;;  %p180_p2 = scmp.ne.s32.totalorder %s117_s6, %s179_s7  ;;  %p185_p4 = scmp.lt.s32.totalorder %s179_s7, %s179_s7 }
  0x2a   :  { %v74_v15 = vadd.f32 %v73_v9, %v72_v5  ;;  %94 = vst [vmem:[#allocation7 + $0x8] sm:$0xff] %v70_v8 }
  0x2b   :  { %v82_v16 = vadd.f32 %v81_v11, %v80_v10  ;;  %v84_v17 = vmul.f32 %v66_v13, %v66_v13  ;;  %v85_v18 = vmul.f32 %v67_v14, %v67_v14  ;;  %102 = vst [vmem:[#allocation7 + $0x18] sm:$0xff] %v78_v12  ;;  %p186_p5 = por %p185_p4, %p184_p3 }
  0x2c   :  { %98 = vst [vmem:[#allocation7 + $0x10] sm:$0xff] %v74_v15 }
  0x2d   :  { %v86_v19 = vadd.f32 %v85_v18, %v84_v17  ;;  %106 = vst [vmem:[#allocation7 + $0x20] sm:$0xff] %v82_v16  ;;  %p187_p6 = pnand %p186_p5, %p180_p2 }
  0x2f   :  { %110 = vst [vmem:[#allocation7 + $0x28] sm:$0xff] %v86_v19 }
  0x30   :  { %190 = shalt.err (!%p187_p6)
}
  0x31   :  { %s191_s10 = scalar_lea.hbm %s274_s2, 768 }
  0x32   :  { %p192_p7 = scmp.ne.s32.totalorder %s274_s2, %s191_s10  ;;  %p195_p8 = scmp.lt.u32.totalorder %s191_s10, %s274_s2 }
  0x34   :  { %p197_p9 = pnand %p195_p8, %p192_p7 }
  0x36   :  { %200 = shalt.err (!%p197_p9)
}
  0x37   :  { %122 = dma.vmem_to_hbm [thread:$0]  %s117_s6, 768, %s274_s2, [#allocation4], %s208_s19, %s208_s19, %s209_s20  }
  0x38   :  { %205 = dma.done.wait [#allocation4], 768  }
  0x39   :  { %206 = vsyncadd [#allocation4], 4294966528 }
  0x3a   :  { %126 = vsyncpa [#allocation3], 1 }
  0x3b   :  { %127 = vsyncpa [#allocation6], 1 }
  0x3c   :  { %128 = vsyncpa [#allocation4], 1 }

</bundles_post_ra>
